<compile_context>
chip_gen: v7x
topology: tpu7x:2x2x1
jax: 0.10.0
libtpu: 0.0.40
codegen_flags: <defaults>
</compile_context>

<pallas_src>
import math
import functools

import jax
import jax.numpy as jnp
from jax import lax
from jax.experimental import pallas as pl
from jax.experimental.pallas import tpu as pltpu


_FALLBACK_LANES = 512                    # lane width for the ragged/pad path
_TARGET_BLOCK_BYTES = 2 * 1024 * 1024    # ~2 MiB block; 4 blocks resident (in+out,
                                         # double-buffered) = 8 MiB << 16 MiB v5e default
_MAX_BLOCK_LANES = 4096                  # cap block lane-width for very wide last dims


def _activate_kernel(x_ref, o_ref, *, activate_fun: str):
    x = x_ref[...]
    if activate_fun == "relu":
        # Native-dtype max: no upcast, no broadcast; compute is pure filler
        # under the DMA pipeline.
        o_ref[...] = jnp.maximum(x, 0)
    else:  # "gelu": exact erf form (matches torch.erf reference), f32 math.
        xf = x.astype(jnp.float32)
        y = xf * 0.5 * (1.0 + lax.erf(xf * (1.0 / math.sqrt(2.0))))
        o_ref[...] = y.astype(o_ref.dtype)


def activate_fun_pallas(x: jax.Array, activate_fun: str = "gelu") -> jax.Array:
    """Elementwise activation (relu or exact erf-gelu) on TPU via Pallas."""
    if activate_fun not in ("relu", "gelu"):
        # TODO(synk): the PyTorch module silently returns None for unknown
        # activations; raising at the wrapper is the closest sane behaviour.
        raise ValueError(f"unsupported activate_fun: {activate_fun!r}")

    orig_shape = x.shape
    n = int(x.size)
    if n == 0:
        return x

    itemsize = jnp.dtype(x.dtype).itemsize

    # --- present a lane-dense (rows, lanes) slab --------------------------------
    padded = False
    if x.ndim >= 2 and orig_shape[-1] % 128 == 0:
        lanes = orig_shape[-1]               # free collapse of leading dims
        rows = n // lanes
        x2d = x.reshape(rows, lanes)
    elif n % 128 == 0:
        # Flat size is 128-aligned: reshape without paying a pad copy.
        lanes = next(w for w in (_FALLBACK_LANES, 256, 128) if n % w == 0)
        rows = n // lanes
        x2d = x.reshape(rows, lanes)
    else:
        lanes = _FALLBACK_LANES
        rows = pl.cdiv(n, lanes)
        pad = rows * lanes - n
        flat = x.reshape(-1)
        flat = jnp.pad(flat, (0, pad))       # zero pad; sliced off below
        x2d = flat.reshape(rows, lanes)
        padded = True

    # --- block shape: (tr rows, tl lanes), ~<= 2 MiB, (8,128)-aligned ------------
    tl = lanes if lanes <= _MAX_BLOCK_LANES else _MAX_BLOCK_LANES
    tr_target = max(8, (_TARGET_BLOCK_BYTES // (tl * itemsize)) // 8 * 8)
    tr = rows if rows <= tr_target else tr_target

    grid = (pl.cdiv(rows, tr), pl.cdiv(lanes, tl))

    kernel = functools.partial(_activate_kernel, activate_fun=activate_fun)

    out2d = pl.pallas_call(
        kernel,
        out_shape=jax.ShapeDtypeStruct((rows, lanes), x.dtype),
        grid=grid,
        in_specs=[pl.BlockSpec((tr, tl), lambda i, j: (i, j))],
        out_specs=pl.BlockSpec((tr, tl), lambda i, j: (i, j)),
        compiler_params=pltpu.CompilerParams(
            dimension_semantics=("parallel", "parallel"),  # megacore sharding on v7x
        ),
    )(x2d)

    if padded:
        return out2d.reshape(-1)[:n].reshape(orig_shape)
    return out2d.reshape(orig_shape)


# ------------------------------- references ------------------------------------
def _gelu_ref(x):
    xf = x.astype(jnp.float32)
    return (xf * 0.5 * (1.0 + lax.erf(xf / math.sqrt(2.0)))).astype(x.dtype)


def _relu_ref(x):
    return jnp.maximum(x, 0)


if __name__ == "__main__":
    key = jax.random.PRNGKey(0)

    # Small BERT-style activation input: (batch, seq, hidden) with hidden=32
    # (exercises the ragged flatten path -> no pad needed since 2*8*32 % 128 == 0).
    x_small = jax.random.normal(key, (2, 8, 32), dtype=jnp.float32)

    y_gelu = activate_fun_pallas(x_small, "gelu")
    jax.block_until_ready(y_gelu)
    assert y_gelu.shape == x_small.shape
    assert jnp.allclose(y_gelu, _gelu_ref(x_small), atol=1e-5, rtol=1e-5)

    y_relu = activate_fun_pallas(x_small, "relu")
    jax.block_until_ready(y_relu)
    assert jnp.allclose(y_relu, _relu_ref(x_small), atol=1e-6)

    # Truly ragged size (exercises the zero-pad path).
    x_odd = jax.random.normal(key, (3, 5, 7), dtype=jnp.float32)
    y_odd = activate_fun_pallas(x_odd, "gelu")
    jax.block_until_ready(y_odd)
    assert jnp.allclose(y_odd, _gelu_ref(x_odd), atol=1e-5, rtol=1e-5)

    # 128-aligned hidden dim (direct (rows, hidden) path, multi-step grid),
    # bf16 to exercise the dtype cast path.
    key2 = jax.random.PRNGKey(0)
    x_big = jax.random.normal(key2, (8, 512, 256), dtype=jnp.bfloat16)
    y_big = activate_fun_pallas(x_big, "gelu")
    jax.block_until_ready(y_big)
    assert jnp.allclose(y_big.astype(jnp.float32),
                        _gelu_ref(x_big).astype(jnp.float32),
                        atol=2e-2, rtol=2e-2)

    print("KERNEL_OK")
</pallas_src>

<mosaic_0001>
module attributes {stable_mosaic.version = 11 : i64} {
  func.func @_activate_kernel(%arg0: i32, %arg1: i32, %arg2: memref<1x512xf32, #tpu.memory_space<vmem>>, %arg3: memref<1x512xf32, #tpu.memory_space<vmem>>) attributes {dimension_semantics = [#tpu.dimension_semantics<parallel>, #tpu.dimension_semantics<parallel>], iteration_bounds = array<i64: 1, 1>, scalar_prefetch = 0 : i64, scratch_operands = 0 : i64, tpu.core_type = #tpu.core_type<tc>, window_params = [{transform_indices = @transform_0, window_bounds = array<i64: 1, 512>}, {transform_indices = @transform_1, window_bounds = array<i64: 1, 512>}]} {
    %c0 = arith.constant 0 : index
    %c0_0 = arith.constant 0 : index
    %0 = vector.load %arg2[%c0, %c0_0] : memref<1x512xf32, #tpu.memory_space<vmem>>, vector<1x512xf32>
    %cst = arith.constant 5.000000e-01 : f32
    %1 = vector.broadcast %cst : f32 to vector<1x512xf32>
    %2 = arith.mulf %0, %1 : vector<1x512xf32>
    %cst_1 = arith.constant 0.707106769 : f32
    %3 = vector.broadcast %cst_1 : f32 to vector<1x512xf32>
    %4 = arith.mulf %0, %3 : vector<1x512xf32>
    %5 = math.erf %4 : vector<1x512xf32>
    %cst_2 = arith.constant 1.000000e+00 : f32
    %6 = vector.broadcast %cst_2 : f32 to vector<1x512xf32>
    %7 = arith.addf %6, %5 : vector<1x512xf32>
    %8 = arith.mulf %2, %7 : vector<1x512xf32>
    %c0_3 = arith.constant 0 : index
    %c0_4 = arith.constant 0 : index
    %9 = vector.load %arg3[%c0_3, %c0_4] : memref<1x512xf32, #tpu.memory_space<vmem>>, vector<1x512xf32>
    tpu.vector_store %arg3[%c0_3, %c0_4], %8 {strides = array<i32>} : memref<1x512xf32, #tpu.memory_space<vmem>>, vector<1x512xf32>,
    return
  }
  func.func @transform_0(%arg0: i32, %arg1: i32) -> (i32, i32) {
    %c0_i32 = arith.constant 0 : i32
    return %arg0, %arg1 : i32, i32
  }
  func.func @transform_1(%arg0: i32, %arg1: i32) -> (i32, i32) {
    %c0_i32 = arith.constant 0 : i32
    return %arg0, %arg1 : i32, i32
  }
}

</mosaic_0001>

<bundles_post_ra>
// kernel: tpu_custom_call.1
= control target key start
LH: loop header
LB: loop body
LE: loop exit
PB: predicated region body
PF: predicated region fallthrough
CT: control target
= control target key end

     0   :  { %6 = vsyncpa [#allocation3], 0  ;;  %s135_s0 = inlined_call_operand.hbm [shape: f32[1,512], index: 0, kind: input, shape index: {}]   ;;  %s136_s1 = inlined_call_operand.hbm [shape: f32[1,512], index: 1, kind: output, shape index: {}]  }
   0x1   :  { %7 = vsyncpa [#allocation4], 0  ;;  %s99_s6 = smov [#allocation2]   ;;  %s51_s10 = scalar_lea.hbm %s135_s0, 64 }
   0x2   :  { %s14_s7 = sshll.u32 %s99_s6, 4  ;;  %p52_p0 = scmp.ne.s32.totalorder %s135_s0, %s51_s10  ;;  %s15_s7 = int_to_ptr.vmem [resolvable:$true] %s14_s7 }
   0x3   :  { %p55_p1 = scmp.lt.u32.totalorder %s51_s10, %s135_s0 }
   0x5   :  { %p57_p2 = pnand %p55_p1, %p52_p0 }
   0x7   :  { %60 = shalt.err (!%p57_p2)
}
   0x8   :  { %s61_s15 = scalar_lea.vmem %s15_s7, 64  ;;  %p66_p4 = scmp.lt.s32.totalorder %s15_s7, %s15_s7 }
   0x9   :  { %p62_p3 = scmp.ne.s32.totalorder %s15_s7, %s61_s15  ;;  %p67_p5 = scmp.lt.s32.totalorder %s61_s15, %s61_s15 }
   0xb   :  { %p68_p6 = por %p67_p5, %p66_p4 }
   0xd   :  { %p69_p7 = pnand %p68_p6, %p62_p3 }
   0xf   :  { %72 = shalt.err (!%p69_p7)
}
  0x10   :  { %17 = dma.hbm_to_vmem [thread:$0]  %s135_s0, 64, %s15_s7, [#allocation3]  }
  0x11   :  { %95 = dma.done.wait [#allocation3], 64  }
  0x12   :  { %96 = vsyncadd [#allocation3], 4294967232  ;;  %v21_v0 = vld [vmem:[#allocation2] sm:$0xf]  ;;  %v27_v2 = vlaneseq  ;;  %s100_s18 = smov [#allocation5]  }
  0x13   :  { %v23_v1 = vmul.f32 0.70710677, %v21_v0  ;;  %v22_v3 = vmul.f32 0.5, %v21_v0  ;;  %s38_s19 = sshll.u32 %s100_s18, 4  ;;  %s39_s19 = int_to_ptr.vmem [resolvable:$true] %s38_s19 }
  0x14   :  { %vm29_vm0 = vcmp.lt.s32.totalorder %v27_v2, 512  ;;  %s73_s20 = scalar_lea.vmem %s39_s19, 64  ;;  %p78_p9 = scmp.lt.s32.totalorder %s39_s19, %s39_s19 }
  0x15   :  { %49 = verf.f32 %v23_v1  ;;  %p74_p8 = scmp.ne.s32.totalorder %s39_s19, %s73_s20  ;;  %p79_p10 = scmp.lt.s32.totalorder %s73_s20, %s73_s20 }
  0x17   :  { %p80_p11 = por %p79_p10, %p78_p9 }
  0x19   :  { %p81_p12 = pnand %p80_p11, %p74_p8 }
  0x1f   :  { %v50_v4 = vpop.eup %49 }
  0x20   :  { %v25_v5 = vadd.f32 1.0, %v50_v4 }
  0x22   :  { %v26_v6 = vmul.f32 %v25_v5, %v22_v3 }
  0x24   :  { %31 = vst.msk [vmem:[#allocation5] sm:$0xf] %vm29_vm0, %v26_v6 }
  0x25   :  { %84 = shalt.err (!%p81_p12)
}
  0x26   :  { %s85_s22 = scalar_lea.hbm %s136_s1, 64 }
  0x27   :  { %p86_p13 = scmp.ne.s32.totalorder %s136_s1, %s85_s22  ;;  %p89_p0 = scmp.lt.u32.totalorder %s85_s22, %s136_s1 }
  0x29   :  { %p91_p1 = pnand %p89_p0, %p86_p13 }
  0x2b   :  { %94 = shalt.err (!%p91_p1)
}
  0x2c   :  { %41 = dma.vmem_to_hbm [thread:$0]  %s39_s19, 64, %s136_s1, [#allocation4]  }
  0x2d   :  { %97 = dma.done.wait [#allocation4], 64  }
  0x2e   :  { %98 = vsyncadd [#allocation4], 4294967232 }
  0x2f   :  { %45 = vsyncpa [#allocation3], 1 }
  0x30   :  { %46 = vsyncpa [#allocation4], 1 }

</bundles_post_ra>
